<compile_context>
chip_gen: v7x
topology: tpu7x:2x2x1
jax: 0.10.0
libtpu: 0.0.40
codegen_flags: <defaults>
</compile_context>

<pallas_src>
import functools

import numpy as np
import jax
import jax.numpy as jnp
from jax import lax
from jax.experimental import pallas as pl
from jax.experimental.pallas import tpu as pltpu

EPS = 1e-5
MATMUL_DTYPE = jnp.bfloat16          # MXU inputs; accumulation stays f32


def _zero_index(i, ndim):
    return (0,) * ndim


# ------------------------------ kernel body -------------------------------- #
def _block_kernel(xh_ref, band1_ref, g1_ref, b1_ref,
                  band2_ref, g2_ref, b2_ref, pool_ref,
                  bandsc_ref, gsc_ref, bsc_ref,
                  o_ref, y1s_ref, *, N, Ho, Wo, Cout, stride):
    s = stride
    M1 = N * Ho                      # rows of every (M, Wo*Cout) tensor
    KO = Wo * Cout
    K1 = xh_ref.shape[-1]            # W * Cin
    inv_cnt = 1.0 / float(M1)        # pool matrix already divides by Wo
    pool = pool_ref[...]             # (KO, KO) group-mean matrix, f32

    def bn(acc, g_r, b_r):
        # Training-mode BatchNorm over (N, Ho, Wo) per channel; the pool
        # matmul averages over the wo lane groups and broadcasts back.
        mean_l = jnp.sum(jnp.dot(acc, pool, preferred_element_type=jnp.float32),
                         axis=0, keepdims=True) * inv_cnt
        cen = acc - mean_l
        var_l = jnp.sum(jnp.dot(cen * cen, pool,
                                preferred_element_type=jnp.float32),
                        axis=0, keepdims=True) * inv_cnt
        scale_l = g_r[...] * lax.rsqrt(var_l + EPS)
        return cen * scale_l + b_r[...]

    def conv3x3(read_rows, band_r):
        acc = jnp.zeros((M1, KO), jnp.float32)
        for kh in range(3):          # 3 deep-K MXU dots (kw folded into band)
            lhs = read_rows(kh).astype(MATMUL_DTYPE)
            acc = acc + jnp.dot(lhs, band_r[kh].astype(MATMUL_DTYPE),
                                preferred_element_type=jnp.float32)
        return acc

    # ---- conv1 (3x3, stride s) + BN1 + ReLU -------------------------------
    def read_x(kh):
        p, off = kh % s, kh // s     # H-phase / row offset of the tap
        return xh_ref[p, :, off:off + Ho, :].reshape(M1, K1)

    acc1 = conv3x3(read_x, band1_ref)
    y1 = jnp.maximum(bn(acc1, g1_ref, b1_ref), 0.0)

    # ---- stage y1 with per-image zero halo rows (halo-only zeroing) --------
    zrow = jnp.zeros((N, 1, KO), jnp.float32)
    y1s_ref[:, 0:1, :] = zrow
    y1s_ref[:, Ho + 1:Ho + 2, :] = zrow
    y1s_ref[:, 1:Ho + 1, :] = y1.reshape(N, Ho, KO)

    # ---- conv2 (3x3, stride 1) + BN2 ---------------------------------------
    def read_y1(kh):
        return y1s_ref[:, kh:kh + Ho, :].reshape(M1, KO)

    acc2 = conv3x3(read_y1, band2_ref)
    y2 = bn(acc2, g2_ref, b2_ref)

    # ---- shortcut (1x1 strided conv + BN, or identity) ---------------------
    p_sc, off_sc = 1 % s, 1 // s     # padded row ho*s + 1  ->  original row ho*s
    x_sc = xh_ref[p_sc, :, off_sc:off_sc + Ho, :].reshape(M1, K1)
    if bandsc_ref is not None:
        sc = jnp.dot(x_sc.astype(MATMUL_DTYPE),
                     bandsc_ref[...].astype(MATMUL_DTYPE),
                     preferred_element_type=jnp.float32)
        sc = bn(sc, gsc_ref, bsc_ref)
    else:
        sc = x_sc                    # identity: K1 == KO here (W==Wo, Cin==Cout)

    # ---- residual add + ReLU, exact-size store -----------------------------
    o_ref[...] = jnp.maximum(y2 + sc, 0.0).astype(o_ref.dtype)


# ------------------------------ JAX wrapper -------------------------------- #
def _conv_band(w, W_in, Wo, stride):
    """(3,3,Ci,Co) HWIO weights -> banded (3, W_in*Ci, Wo*Co) matrices.
    Folds the kw taps, the W zero-padding and the W stride."""
    _, _, Ci, Co = w.shape
    sel = np.zeros((3, W_in, Wo), np.float32)
    for q in range(3):
        for wo in range(Wo):
            w_in = wo * stride + q - 1
            if 0 <= w_in < W_in:
                sel[q, w_in, wo] = 1.0
    band = jnp.einsum("qxw,kqic->kxiwc", sel, w.astype(jnp.float32))
    return band.reshape(3, W_in * Ci, Wo * Co)


def _shortcut_band(wsc, W_in, Wo, stride):
    Ci, Co = wsc.shape
    sel = np.zeros((W_in, Wo), np.float32)
    for wo in range(Wo):
        sel[wo * stride, wo] = 1.0
    band = jnp.einsum("xw,ic->xiwc", sel, wsc.astype(jnp.float32))
    return band.reshape(W_in * Ci, Wo * Co)


def basic_block_forward(x_nhwc, params, stride):
    N, H, W, Cin = x_nhwc.shape
    Cout = params["w1"].shape[-1]
    has_proj = "w_sc" in params
    if not has_proj:
        assert stride == 1 and Cin == Cout, \
            "identity shortcut requires stride == 1 and Cin == Cout"

    s = stride
    Ho = (H - 1) // s + 1
    Wo = (W - 1) // s + 1
    KO = Wo * Cout
    M1 = N * Ho

    # H halo pad (narrow channels!) + H-phase decomposition (handles stride
    # along H); W stride / padding are folded into the banded weights.
    xp = jnp.pad(x_nhwc.astype(jnp.float32), ((0, 0), (1, 1), (0, 0), (0, 0)))
    Hp = H + 2
    Hph = -(-Hp // s)
    phases = []
    for p in range(s):
        ph = xp[:, p::s, :, :]
        ph = jnp.pad(ph, ((0, 0), (0, Hph - ph.shape[1]), (0, 0), (0, 0)))
        phases.append(ph.reshape(N, Hph, W * Cin))
    xh = jnp.stack(phases)                       # (s, N, Hph, W*Cin)

    def tile_vec(v):                             # (C,) -> (1, Wo*C) lane layout
        return jnp.tile(v.astype(jnp.float32).reshape(1, -1), (1, Wo))

    # per-channel group-mean matrix over the wo lane groups
    pool = jnp.asarray(np.tile(np.eye(Cout, dtype=np.float32), (Wo, Wo)) /
                       np.float32(Wo))

    inputs = [xh,
              _conv_band(params["w1"], W, Wo, s),
              tile_vec(params["g1"]), tile_vec(params["b1"]),
              _conv_band(params["w2"], Wo, Wo, 1),
              tile_vec(params["g2"]), tile_vec(params["b2"]),
              pool]
    if has_proj:
        inputs += [_shortcut_band(params["w_sc"], W, Wo, s),
                   tile_vec(params["g_sc"]), tile_vec(params["b_sc"])]

    in_specs = [pl.BlockSpec(a.shape, functools.partial(_zero_index, ndim=a.ndim))
                for a in inputs]

    kernel_fn = functools.partial(_block_kernel, N=N, Ho=Ho, Wo=Wo,
                                  Cout=Cout, stride=s)
    if has_proj:
        kernel = kernel_fn
    else:
        def kernel(xh_r, b1_r, g1_r, bb1_r, b2_r, g2_r, bb2_r, pool_r,
                   o_r, y1s_r):
            kernel_fn(xh_r, b1_r, g1_r, bb1_r, b2_r, g2_r, bb2_r, pool_r,
                      None, None, None, o_r, y1s_r)

    out = pl.pallas_call(
        kernel,
        out_shape=jax.ShapeDtypeStruct((M1, KO), jnp.float32),
        grid=(1,),
        in_specs=in_specs,
        out_specs=pl.BlockSpec((M1, KO), lambda i: (0, 0)),
        scratch_shapes=[pltpu.VMEM((N, Ho + 2, KO), jnp.float32)],
        compiler_params=pltpu.CompilerParams(
            dimension_semantics=("arbitrary",)),
    )(*inputs)

    return out.reshape(N, Ho, Wo, Cout)          # free metadata reshape


# --------------------------- pure-JAX reference ----------------------------- #
def reference_forward(x_nhwc, params, stride):
    def conv(x, w, s, pad):
        return lax.conv_general_dilated(
            x, w, window_strides=(s, s), padding=pad,
            dimension_numbers=("NHWC", "HWIO", "NHWC"),
            precision=lax.Precision.HIGHEST)

    def bn(y, g, b):
        mean = jnp.mean(y, axis=(0, 1, 2), keepdims=True)
        var = jnp.mean((y - mean) ** 2, axis=(0, 1, 2), keepdims=True)
        return (y - mean) * lax.rsqrt(var + EPS) * g + b

    y = jax.nn.relu(bn(conv(x_nhwc, params["w1"], stride, ((1, 1), (1, 1))),
                       params["g1"], params["b1"]))
    y = bn(conv(y, params["w2"], 1, ((1, 1), (1, 1))),
           params["g2"], params["b2"])
    if "w_sc" in params:
        Cin, Cout = params["w_sc"].shape
        sc = conv(x_nhwc, params["w_sc"].reshape(1, 1, Cin, Cout),
                  stride, "VALID")
        sc = bn(sc, params["g_sc"], params["b_sc"])
    else:
        sc = x_nhwc
    return jax.nn.relu(y + sc)


def _make_params(key, Cin, Cout, projection):
    ks = jax.random.split(key, 10)
    p = {
        "w1": jax.random.normal(ks[0], (3, 3, Cin, Cout), jnp.float32)
              * (1.0 / (9 * Cin) ** 0.5),
        "g1": 1.0 + 0.1 * jax.random.normal(ks[1], (Cout,), jnp.float32),
        "b1": 0.1 * jax.random.normal(ks[2], (Cout,), jnp.float32),
        "w2": jax.random.normal(ks[3], (3, 3, Cout, Cout), jnp.float32)
              * (1.0 / (9 * Cout) ** 0.5),
        "g2": 1.0 + 0.1 * jax.random.normal(ks[4], (Cout,), jnp.float32),
        "b2": 0.1 * jax.random.normal(ks[5], (Cout,), jnp.float32),
    }
    if projection:
        p["w_sc"] = jax.random.normal(ks[6], (Cin, Cout), jnp.float32) \
                    * (1.0 / Cin ** 0.5)
        p["g_sc"] = 1.0 + 0.1 * jax.random.normal(ks[7], (Cout,), jnp.float32)
        p["b_sc"] = 0.1 * jax.random.normal(ks[8], (Cout,), jnp.float32)
    return p


# ----------------------------------- main ----------------------------------- #
if __name__ == "__main__":
    key = jax.random.PRNGKey(0)
    k0, k1, k2, k3 = jax.random.split(key, 4)

    # case 1: projection shortcut (Cin != Cout, stride 2) — matches PyTorch spec
    N, Cin, H, W, Cout, stride = 2, 4, 16, 16, 8, 2
    x_nchw = jax.random.normal(k0, (N, Cin, H, W), jnp.float32)   # PyTorch NCHW
    x = jnp.transpose(x_nchw, (0, 2, 3, 1))                       # -> NHWC
    params = _make_params(k1, Cin, Cout, projection=True)

    fwd = jax.jit(functools.partial(basic_block_forward, stride=stride))
    out = jax.block_until_ready(fwd(x, params))
    ref = reference_forward(x, params, stride)
    assert out.shape == ref.shape
    assert jnp.allclose(out, ref, atol=3e-2, rtol=3e-2)

    # case 2: identity shortcut (Cin == Cout, stride 1)
    N2, C2, H2, W2 = 2, 8, 8, 8
    x2 = jnp.transpose(jax.random.normal(k2, (N2, C2, H2, W2), jnp.float32),
                       (0, 2, 3, 1))
    params2 = _make_params(k3, C2, C2, projection=False)
    fwd2 = jax.jit(functools.partial(basic_block_forward, stride=1))
    out2 = jax.block_until_ready(fwd2(x2, params2))
    ref2 = reference_forward(x2, params2, 1)
    assert out2.shape == ref2.shape
    assert jnp.allclose(out2, ref2, atol=3e-2, rtol=3e-2)

    print("KERNEL_OK")
</pallas_src>

<mosaic_0001>
module attributes {stable_mosaic.version = 11 : i64} {
  func.func @_block_kernel(%arg0: i32, %arg1: memref<2x2x9x64xf32, #tpu.memory_space<vmem>>, %arg2: memref<3x64x64xf32, #tpu.memory_space<vmem>>, %arg3: memref<1x64xf32, #tpu.memory_space<vmem>>, %arg4: memref<1x64xf32, #tpu.memory_space<vmem>>, %arg5: memref<3x64x64xf32, #tpu.memory_space<vmem>>, %arg6: memref<1x64xf32, #tpu.memory_space<vmem>>, %arg7: memref<1x64xf32, #tpu.memory_space<vmem>>, %arg8: memref<64x64xf32, #tpu.memory_space<vmem>>, %arg9: memref<64x64xf32, #tpu.memory_space<vmem>>, %arg10: memref<1x64xf32, #tpu.memory_space<vmem>>, %arg11: memref<1x64xf32, #tpu.memory_space<vmem>>, %arg12: memref<16x64xf32, #tpu.memory_space<vmem>>, %arg13: memref<2x10x64xf32, #tpu.memory_space<vmem>>) attributes {dimension_semantics = [#tpu.dimension_semantics<arbitrary>], iteration_bounds = array<i64: 1>, scalar_prefetch = 0 : i64, scratch_operands = 1 : i64, tpu.core_type = #tpu.core_type<tc>, window_params = [{pipeline_mode = #tpu.pipeline_mode<synchronous>, transform_indices = @transform_0, window_bounds = array<i64: 2, 2, 9, 64>}, {pipeline_mode = #tpu.pipeline_mode<synchronous>, transform_indices = @transform_1, window_bounds = array<i64: 3, 64, 64>}, {pipeline_mode = #tpu.pipeline_mode<synchronous>, transform_indices = @transform_2, window_bounds = array<i64: 1, 64>}, {pipeline_mode = #tpu.pipeline_mode<synchronous>, transform_indices = @transform_3, window_bounds = array<i64: 1, 64>}, {pipeline_mode = #tpu.pipeline_mode<synchronous>, transform_indices = @transform_4, window_bounds = array<i64: 3, 64, 64>}, {pipeline_mode = #tpu.pipeline_mode<synchronous>, transform_indices = @transform_5, window_bounds = array<i64: 1, 64>}, {pipeline_mode = #tpu.pipeline_mode<synchronous>, transform_indices = @transform_6, window_bounds = array<i64: 1, 64>}, {pipeline_mode = #tpu.pipeline_mode<synchronous>, transform_indices = @transform_7, window_bounds = array<i64: 64, 64>}, {pipeline_mode = #tpu.pipeline_mode<synchronous>, transform_indices = @transform_8, window_bounds = array<i64: 64, 64>}, {pipeline_mode = #tpu.pipeline_mode<synchronous>, transform_indices = @transform_9, window_bounds = array<i64: 1, 64>}, {pipeline_mode = #tpu.pipeline_mode<synchronous>, transform_indices = @transform_10, window_bounds = array<i64: 1, 64>}, {pipeline_mode = #tpu.pipeline_mode<synchronous>, transform_indices = @transform_11, window_bounds = array<i64: 16, 64>}]} {
    %c0 = arith.constant 0 : index
    %c0_0 = arith.constant 0 : index
    %0 = vector.load %arg8[%c0, %c0_0] : memref<64x64xf32, #tpu.memory_space<vmem>>, vector<64x64xf32>
    %cst = arith.constant 0.000000e+00 : f32
    %1 = vector.broadcast %cst : f32 to vector<16x64xf32>
    %c0_1 = arith.constant 0 : index
    %c0_2 = arith.constant 0 : index
    %c0_3 = arith.constant 0 : index
    %c0_4 = arith.constant 0 : index
    %2 = vector.load %arg1[%c0_1, %c0_2, %c0_3, %c0_4] : memref<2x2x9x64xf32, #tpu.memory_space<vmem>>, vector<1x2x8x64xf32>
    %3 = vector.shape_cast %2 : vector<1x2x8x64xf32> to vector<2x8x64xf32>
    %4 = vector.shape_cast %3 : vector<2x8x64xf32> to vector<16x64xf32>
    %5 = arith.truncf %4 : vector<16x64xf32> to vector<16x64xbf16>
    %c0_5 = arith.constant 0 : index
    %c0_6 = arith.constant 0 : index
    %c0_7 = arith.constant 0 : index
    %6 = vector.load %arg2[%c0_5, %c0_6, %c0_7] : memref<3x64x64xf32, #tpu.memory_space<vmem>>, vector<1x64x64xf32>
    %7 = vector.shape_cast %6 : vector<1x64x64xf32> to vector<64x64xf32>
    %8 = arith.truncf %7 : vector<64x64xf32> to vector<64x64xbf16>
    %cst_8 = arith.constant dense<0.000000e+00> : vector<16x64xf32>
    %9 = tpu.matmul %5, %8, %cst_8 {dimension_numbers = #tpu.dot_dimension_numbers<[1], [0], [0], [1], [0, 0, 1, 1], [], []>} : vector<16x64xbf16>, vector<64x64xbf16>, vector<16x64xf32> -> vector<16x64xf32>
    %10 = arith.addf %1, %9 : vector<16x64xf32>
    %c1 = arith.constant 1 : index
    %c0_9 = arith.constant 0 : index
    %c0_10 = arith.constant 0 : index
    %c0_11 = arith.constant 0 : index
    %11 = vector.load %arg1[%c1, %c0_9, %c0_10, %c0_11] : memref<2x2x9x64xf32, #tpu.memory_space<vmem>>, vector<1x2x8x64xf32>
    %12 = vector.shape_cast %11 : vector<1x2x8x64xf32> to vector<2x8x64xf32>
    %13 = vector.shape_cast %12 : vector<2x8x64xf32> to vector<16x64xf32>
    %14 = arith.truncf %13 : vector<16x64xf32> to vector<16x64xbf16>
    %c1_12 = arith.constant 1 : index
    %c0_13 = arith.constant 0 : index
    %c0_14 = arith.constant 0 : index
    %15 = vector.load %arg2[%c1_12, %c0_13, %c0_14] : memref<3x64x64xf32, #tpu.memory_space<vmem>>, vector<1x64x64xf32>
    %16 = vector.shape_cast %15 : vector<1x64x64xf32> to vector<64x64xf32>
    %17 = arith.truncf %16 : vector<64x64xf32> to vector<64x64xbf16>
    %cst_15 = arith.constant dense<0.000000e+00> : vector<16x64xf32>
    %18 = tpu.matmul %14, %17, %cst_15 {dimension_numbers = #tpu.dot_dimension_numbers<[1], [0], [0], [1], [0, 0, 1, 1], [], []>} : vector<16x64xbf16>, vector<64x64xbf16>, vector<16x64xf32> -> vector<16x64xf32>
    %19 = arith.addf %10, %18 : vector<16x64xf32>
    %c0_16 = arith.constant 0 : index
    %c0_17 = arith.constant 0 : index
    %c1_18 = arith.constant 1 : index
    %c0_19 = arith.constant 0 : index
    %20 = vector.load %arg1[%c0_16, %c0_17, %c1_18, %c0_19] : memref<2x2x9x64xf32, #tpu.memory_space<vmem>>, vector<1x2x8x64xf32>
    %21 = vector.shape_cast %20 : vector<1x2x8x64xf32> to vector<2x8x64xf32>
    %22 = vector.shape_cast %21 : vector<2x8x64xf32> to vector<16x64xf32>
    %23 = arith.truncf %22 : vector<16x64xf32> to vector<16x64xbf16>
    %c2 = arith.constant 2 : index
    %c0_20 = arith.constant 0 : index
    %c0_21 = arith.constant 0 : index
    %24 = vector.load %arg2[%c2, %c0_20, %c0_21] : memref<3x64x64xf32, #tpu.memory_space<vmem>>, vector<1x64x64xf32>
    %25 = vector.shape_cast %24 : vector<1x64x64xf32> to vector<64x64xf32>
    %26 = arith.truncf %25 : vector<64x64xf32> to vector<64x64xbf16>
    %cst_22 = arith.constant dense<0.000000e+00> : vector<16x64xf32>
    %27 = tpu.matmul %23, %26, %cst_22 {dimension_numbers = #tpu.dot_dimension_numbers<[1], [0], [0], [1], [0, 0, 1, 1], [], []>} : vector<16x64xbf16>, vector<64x64xbf16>, vector<16x64xf32> -> vector<16x64xf32>
    %28 = arith.addf %19, %27 : vector<16x64xf32>
    %cst_23 = arith.constant dense<0.000000e+00> : vector<16x64xf32>
    %29 = tpu.matmul %28, %0, %cst_23 {dimension_numbers = #tpu.dot_dimension_numbers<[1], [0], [0], [1], [0, 0, 1, 1], [], []>} : vector<16x64xf32>, vector<64x64xf32>, vector<16x64xf32> -> vector<16x64xf32>
    %cst_24 = arith.constant dense<0.000000e+00> : vector<64xf32>
    %30 = vector.multi_reduction <add>, %29, %cst_24 [0] : vector<16x64xf32> to vector<64xf32>
    %31 = vector.shape_cast %30 : vector<64xf32> to vector<1x64xf32>
    %cst_25 = arith.constant 6.250000e-02 : f32
    %32 = vector.broadcast %cst_25 : f32 to vector<1x64xf32>
    %33 = arith.mulf %31, %32 : vector<1x64xf32>
    %34 = vector.broadcast %33 : vector<1x64xf32> to vector<16x64xf32>
    %35 = arith.subf %28, %34 : vector<16x64xf32>
    %36 = arith.mulf %35, %35 : vector<16x64xf32>
    %cst_26 = arith.constant dense<0.000000e+00> : vector<16x64xf32>
    %37 = tpu.matmul %36, %0, %cst_26 {dimension_numbers = #tpu.dot_dimension_numbers<[1], [0], [0], [1], [0, 0, 1, 1], [], []>} : vector<16x64xf32>, vector<64x64xf32>, vector<16x64xf32> -> vector<16x64xf32>
    %cst_27 = arith.constant dense<0.000000e+00> : vector<64xf32>
    %38 = vector.multi_reduction <add>, %37, %cst_27 [0] : vector<16x64xf32> to vector<64xf32>
    %39 = vector.shape_cast %38 : vector<64xf32> to vector<1x64xf32>
    %cst_28 = arith.constant 6.250000e-02 : f32
    %40 = vector.broadcast %cst_28 : f32 to vector<1x64xf32>
    %41 = arith.mulf %39, %40 : vector<1x64xf32>
    %c0_29 = arith.constant 0 : index
    %c0_30 = arith.constant 0 : index
    %42 = vector.load %arg3[%c0_29, %c0_30] : memref<1x64xf32, #tpu.memory_space<vmem>>, vector<1x64xf32>
    %cst_31 = arith.constant 9.99999974E-6 : f32
    %43 = vector.broadcast %cst_31 : f32 to vector<1x64xf32>
    %44 = arith.addf %41, %43 : vector<1x64xf32>
    %45 = math.rsqrt %44 : vector<1x64xf32>
    %46 = arith.mulf %42, %45 : vector<1x64xf32>
    %47 = vector.broadcast %46 : vector<1x64xf32> to vector<16x64xf32>
    %48 = arith.mulf %35, %47 : vector<16x64xf32>
    %c0_32 = arith.constant 0 : index
    %c0_33 = arith.constant 0 : index
    %49 = vector.load %arg4[%c0_32, %c0_33] : memref<1x64xf32, #tpu.memory_space<vmem>>, vector<1x64xf32>
    %50 = vector.broadcast %49 : vector<1x64xf32> to vector<16x64xf32>
    %51 = arith.addf %48, %50 : vector<16x64xf32>
    %cst_34 = arith.constant 0.000000e+00 : f32
    %52 = vector.broadcast %cst_34 : f32 to vector<16x64xf32>
    %53 = arith.maximumf %51, %52 : vector<16x64xf32>
    %cst_35 = arith.constant 0.000000e+00 : f32
    %54 = vector.broadcast %cst_35 : f32 to vector<2x1x64xf32>
    %c0_36 = arith.constant 0 : index
    %c0_37 = arith.constant 0 : index
    %c0_38 = arith.constant 0 : index
    %55 = vector.load %arg13[%c0_36, %c0_37, %c0_38] : memref<2x10x64xf32, #tpu.memory_space<vmem>>, vector<2x1x64xf32>
    tpu.vector_store %arg13[%c0_36, %c0_37, %c0_38], %54 {strides = array<i32>} : memref<2x10x64xf32, #tpu.memory_space<vmem>>, vector<2x1x64xf32>,
    %c0_39 = arith.constant 0 : index
    %c9 = arith.constant 9 : index
    %c0_40 = arith.constant 0 : index
    %56 = vector.load %arg13[%c0_39, %c9, %c0_40] : memref<2x10x64xf32, #tpu.memory_space<vmem>>, vector<2x1x64xf32>
    tpu.vector_store %arg13[%c0_39, %c9, %c0_40], %54 {strides = array<i32>} : memref<2x10x64xf32, #tpu.memory_space<vmem>>, vector<2x1x64xf32>,
    %57 = vector.shape_cast %53 : vector<16x64xf32> to vector<2x8x64xf32>
    %c0_41 = arith.constant 0 : index
    %c1_42 = arith.constant 1 : index
    %c0_43 = arith.constant 0 : index
    %58 = vector.load %arg13[%c0_41, %c1_42, %c0_43] : memref<2x10x64xf32, #tpu.memory_space<vmem>>, vector<2x8x64xf32>
    tpu.vector_store %arg13[%c0_41, %c1_42, %c0_43], %57 {strides = array<i32>} : memref<2x10x64xf32, #tpu.memory_space<vmem>>, vector<2x8x64xf32>,
    %cst_44 = arith.constant 0.000000e+00 : f32
    %59 = vector.broadcast %cst_44 : f32 to vector<16x64xf32>
    %c0_45 = arith.constant 0 : index
    %c0_46 = arith.constant 0 : index
    %c0_47 = arith.constant 0 : index
    %60 = vector.load %arg13[%c0_45, %c0_46, %c0_47] : memref<2x10x64xf32, #tpu.memory_space<vmem>>, vector<2x8x64xf32>
    %61 = vector.shape_cast %60 : vector<2x8x64xf32> to vector<16x64xf32>
    %62 = arith.truncf %61 : vector<16x64xf32> to vector<16x64xbf16>
    %c0_48 = arith.constant 0 : index
    %c0_49 = arith.constant 0 : index
    %c0_50 = arith.constant 0 : index
    %63 = vector.load %arg5[%c0_48, %c0_49, %c0_50] : memref<3x64x64xf32, #tpu.memory_space<vmem>>, vector<1x64x64xf32>
    %64 = vector.shape_cast %63 : vector<1x64x64xf32> to vector<64x64xf32>
    %65 = arith.truncf %64 : vector<64x64xf32> to vector<64x64xbf16>
    %cst_51 = arith.constant dense<0.000000e+00> : vector<16x64xf32>
    %66 = tpu.matmul %62, %65, %cst_51 {dimension_numbers = #tpu.dot_dimension_numbers<[1], [0], [0], [1], [0, 0, 1, 1], [], []>} : vector<16x64xbf16>, vector<64x64xbf16>, vector<16x64xf32> -> vector<16x64xf32>
    %67 = arith.addf %59, %66 : vector<16x64xf32>
    %c0_52 = arith.constant 0 : index
    %c1_53 = arith.constant 1 : index
    %c0_54 = arith.constant 0 : index
    %68 = vector.load %arg13[%c0_52, %c1_53, %c0_54] : memref<2x10x64xf32, #tpu.memory_space<vmem>>, vector<2x8x64xf32>
    %69 = vector.shape_cast %68 : vector<2x8x64xf32> to vector<16x64xf32>
    %70 = arith.truncf %69 : vector<16x64xf32> to vector<16x64xbf16>
    %c1_55 = arith.constant 1 : index
    %c0_56 = arith.constant 0 : index
    %c0_57 = arith.constant 0 : index
    %71 = vector.load %arg5[%c1_55, %c0_56, %c0_57] : memref<3x64x64xf32, #tpu.memory_space<vmem>>, vector<1x64x64xf32>
    %72 = vector.shape_cast %71 : vector<1x64x64xf32> to vector<64x64xf32>
    %73 = arith.truncf %72 : vector<64x64xf32> to vector<64x64xbf16>
    %cst_58 = arith.constant dense<0.000000e+00> : vector<16x64xf32>
    %74 = tpu.matmul %70, %73, %cst_58 {dimension_numbers = #tpu.dot_dimension_numbers<[1], [0], [0], [1], [0, 0, 1, 1], [], []>} : vector<16x64xbf16>, vector<64x64xbf16>, vector<16x64xf32> -> vector<16x64xf32>
    %75 = arith.addf %67, %74 : vector<16x64xf32>
    %c0_59 = arith.constant 0 : index
    %c2_60 = arith.constant 2 : index
    %c0_61 = arith.constant 0 : index
    %76 = vector.load %arg13[%c0_59, %c2_60, %c0_61] : memref<2x10x64xf32, #tpu.memory_space<vmem>>, vector<2x8x64xf32>
    %77 = vector.shape_cast %76 : vector<2x8x64xf32> to vector<16x64xf32>
    %78 = arith.truncf %77 : vector<16x64xf32> to vector<16x64xbf16>
    %c2_62 = arith.constant 2 : index
    %c0_63 = arith.constant 0 : index
    %c0_64 = arith.constant 0 : index
    %79 = vector.load %arg5[%c2_62, %c0_63, %c0_64] : memref<3x64x64xf32, #tpu.memory_space<vmem>>, vector<1x64x64xf32>
    %80 = vector.shape_cast %79 : vector<1x64x64xf32> to vector<64x64xf32>
    %81 = arith.truncf %80 : vector<64x64xf32> to vector<64x64xbf16>
    %cst_65 = arith.constant dense<0.000000e+00> : vector<16x64xf32>
    %82 = tpu.matmul %78, %81, %cst_65 {dimension_numbers = #tpu.dot_dimension_numbers<[1], [0], [0], [1], [0, 0, 1, 1], [], []>} : vector<16x64xbf16>, vector<64x64xbf16>, vector<16x64xf32> -> vector<16x64xf32>
    %83 = arith.addf %75, %82 : vector<16x64xf32>
    %cst_66 = arith.constant dense<0.000000e+00> : vector<16x64xf32>
    %84 = tpu.matmul %83, %0, %cst_66 {dimension_numbers = #tpu.dot_dimension_numbers<[1], [0], [0], [1], [0, 0, 1, 1], [], []>} : vector<16x64xf32>, vector<64x64xf32>, vector<16x64xf32> -> vector<16x64xf32>
    %cst_67 = arith.constant dense<0.000000e+00> : vector<64xf32>
    %85 = vector.multi_reduction <add>, %84, %cst_67 [0] : vector<16x64xf32> to vector<64xf32>
    %86 = vector.shape_cast %85 : vector<64xf32> to vector<1x64xf32>
    %cst_68 = arith.constant 6.250000e-02 : f32
    %87 = vector.broadcast %cst_68 : f32 to vector<1x64xf32>
    %88 = arith.mulf %86, %87 : vector<1x64xf32>
    %89 = vector.broadcast %88 : vector<1x64xf32> to vector<16x64xf32>
    %90 = arith.subf %83, %89 : vector<16x64xf32>
    %91 = arith.mulf %90, %90 : vector<16x64xf32>
    %cst_69 = arith.constant dense<0.000000e+00> : vector<16x64xf32>
    %92 = tpu.matmul %91, %0, %cst_69 {dimension_numbers = #tpu.dot_dimension_numbers<[1], [0], [0], [1], [0, 0, 1, 1], [], []>} : vector<16x64xf32>, vector<64x64xf32>, vector<16x64xf32> -> vector<16x64xf32>
    %cst_70 = arith.constant dense<0.000000e+00> : vector<64xf32>
    %93 = vector.multi_reduction <add>, %92, %cst_70 [0] : vector<16x64xf32> to vector<64xf32>
    %94 = vector.shape_cast %93 : vector<64xf32> to vector<1x64xf32>
    %cst_71 = arith.constant 6.250000e-02 : f32
    %95 = vector.broadcast %cst_71 : f32 to vector<1x64xf32>
    %96 = arith.mulf %94, %95 : vector<1x64xf32>
    %c0_72 = arith.constant 0 : index
    %c0_73 = arith.constant 0 : index
    %97 = vector.load %arg6[%c0_72, %c0_73] : memref<1x64xf32, #tpu.memory_space<vmem>>, vector<1x64xf32>
    %cst_74 = arith.constant 9.99999974E-6 : f32
    %98 = vector.broadcast %cst_74 : f32 to vector<1x64xf32>
    %99 = arith.addf %96, %98 : vector<1x64xf32>
    %100 = math.rsqrt %99 : vector<1x64xf32>
    %101 = arith.mulf %97, %100 : vector<1x64xf32>
    %102 = vector.broadcast %101 : vector<1x64xf32> to vector<16x64xf32>
    %103 = arith.mulf %90, %102 : vector<16x64xf32>
    %c0_75 = arith.constant 0 : index
    %c0_76 = arith.constant 0 : index
    %104 = vector.load %arg7[%c0_75, %c0_76] : memref<1x64xf32, #tpu.memory_space<vmem>>, vector<1x64xf32>
    %105 = vector.broadcast %104 : vector<1x64xf32> to vector<16x64xf32>
    %106 = arith.addf %103, %105 : vector<16x64xf32>
    %c1_77 = arith.constant 1 : index
    %c0_78 = arith.constant 0 : index
    %c0_79 = arith.constant 0 : index
    %c0_80 = arith.constant 0 : index
    %107 = vector.load %arg1[%c1_77, %c0_78, %c0_79, %c0_80] : memref<2x2x9x64xf32, #tpu.memory_space<vmem>>, vector<1x2x8x64xf32>
    %108 = vector.shape_cast %107 : vector<1x2x8x64xf32> to vector<2x8x64xf32>
    %109 = vector.shape_cast %108 : vector<2x8x64xf32> to vector<16x64xf32>
    %110 = arith.truncf %109 : vector<16x64xf32> to vector<16x64xbf16>
    %c0_81 = arith.constant 0 : index
    %c0_82 = arith.constant 0 : index
    %111 = vector.load %arg9[%c0_81, %c0_82] : memref<64x64xf32, #tpu.memory_space<vmem>>, vector<64x64xf32>
    %112 = arith.truncf %111 : vector<64x64xf32> to vector<64x64xbf16>
    %cst_83 = arith.constant dense<0.000000e+00> : vector<16x64xf32>
    %113 = tpu.matmul %110, %112, %cst_83 {dimension_numbers = #tpu.dot_dimension_numbers<[1], [0], [0], [1], [0, 0, 1, 1], [], []>} : vector<16x64xbf16>, vector<64x64xbf16>, vector<16x64xf32> -> vector<16x64xf32>
    %cst_84 = arith.constant dense<0.000000e+00> : vector<16x64xf32>
    %114 = tpu.matmul %113, %0, %cst_84 {dimension_numbers = #tpu.dot_dimension_numbers<[1], [0], [0], [1], [0, 0, 1, 1], [], []>} : vector<16x64xf32>, vector<64x64xf32>, vector<16x64xf32> -> vector<16x64xf32>
    %cst_85 = arith.constant dense<0.000000e+00> : vector<64xf32>
    %115 = vector.multi_reduction <add>, %114, %cst_85 [0] : vector<16x64xf32> to vector<64xf32>
    %116 = vector.shape_cast %115 : vector<64xf32> to vector<1x64xf32>
    %cst_86 = arith.constant 6.250000e-02 : f32
    %117 = vector.broadcast %cst_86 : f32 to vector<1x64xf32>
    %118 = arith.mulf %116, %117 : vector<1x64xf32>
    %119 = vector.broadcast %118 : vector<1x64xf32> to vector<16x64xf32>
    %120 = arith.subf %113, %119 : vector<16x64xf32>
    %121 = arith.mulf %120, %120 : vector<16x64xf32>
    %cst_87 = arith.constant dense<0.000000e+00> : vector<16x64xf32>
    %122 = tpu.matmul %121, %0, %cst_87 {dimension_numbers = #tpu.dot_dimension_numbers<[1], [0], [0], [1], [0, 0, 1, 1], [], []>} : vector<16x64xf32>, vector<64x64xf32>, vector<16x64xf32> -> vector<16x64xf32>
    %cst_88 = arith.constant dense<0.000000e+00> : vector<64xf32>
    %123 = vector.multi_reduction <add>, %122, %cst_88 [0] : vector<16x64xf32> to vector<64xf32>
    %124 = vector.shape_cast %123 : vector<64xf32> to vector<1x64xf32>
    %cst_89 = arith.constant 6.250000e-02 : f32
    %125 = vector.broadcast %cst_89 : f32 to vector<1x64xf32>
    %126 = arith.mulf %124, %125 : vector<1x64xf32>
    %c0_90 = arith.constant 0 : index
    %c0_91 = arith.constant 0 : index
    %127 = vector.load %arg10[%c0_90, %c0_91] : memref<1x64xf32, #tpu.memory_space<vmem>>, vector<1x64xf32>
    %cst_92 = arith.constant 9.99999974E-6 : f32
    %128 = vector.broadcast %cst_92 : f32 to vector<1x64xf32>
    %129 = arith.addf %126, %128 : vector<1x64xf32>
    %130 = math.rsqrt %129 : vector<1x64xf32>
    %131 = arith.mulf %127, %130 : vector<1x64xf32>
    %132 = vector.broadcast %131 : vector<1x64xf32> to vector<16x64xf32>
    %133 = arith.mulf %120, %132 : vector<16x64xf32>
    %c0_93 = arith.constant 0 : index
    %c0_94 = arith.constant 0 : index
    %134 = vector.load %arg11[%c0_93, %c0_94] : memref<1x64xf32, #tpu.memory_space<vmem>>, vector<1x64xf32>
    %135 = vector.broadcast %134 : vector<1x64xf32> to vector<16x64xf32>
    %136 = arith.addf %133, %135 : vector<16x64xf32>
    %137 = arith.addf %106, %136 : vector<16x64xf32>
    %cst_95 = arith.constant 0.000000e+00 : f32
    %138 = vector.broadcast %cst_95 : f32 to vector<16x64xf32>
    %139 = arith.maximumf %137, %138 : vector<16x64xf32>
    %c0_96 = arith.constant 0 : index
    %c0_97 = arith.constant 0 : index
    %140 = vector.load %arg12[%c0_96, %c0_97] : memref<16x64xf32, #tpu.memory_space<vmem>>, vector<16x64xf32>
    tpu.vector_store %arg12[%c0_96, %c0_97], %139 {strides = array<i32>} : memref<16x64xf32, #tpu.memory_space<vmem>>, vector<16x64xf32>,
    return
  }
  func.func @transform_0(%arg0: i32) -> (i32, i32, i32, i32) {
    %c0_i32 = arith.constant 0 : i32
    %c0_i32_0 = arith.constant 0 : i32
    %c0_i32_1 = arith.constant 0 : i32
    %c0_i32_2 = arith.constant 0 : i32
    %c0_i32_3 = arith.constant 0 : i32
    return %c0_i32, %c0_i32_0, %c0_i32_1, %c0_i32_2 : i32, i32, i32, i32
  }
  func.func @transform_1(%arg0: i32) -> (i32, i32, i32) {
    %c0_i32 = arith.constant 0 : i32
    %c0_i32_0 = arith.constant 0 : i32
    %c0_i32_1 = arith.constant 0 : i32
    %c0_i32_2 = arith.constant 0 : i32
    return %c0_i32, %c0_i32_0, %c0_i32_1 : i32, i32, i32
  }
  func.func @transform_2(%arg0: i32) -> (i32, i32) {
    %c0_i32 = arith.constant 0 : i32
    %c0_i32_0 = arith.constant 0 : i32
    %c0_i32_1 = arith.constant 0 : i32
    return %c0_i32, %c0_i32_0 : i32, i32
  }
  func.func @transform_3(%arg0: i32) -> (i32, i32) {
    %c0_i32 = arith.constant 0 : i32
    %c0_i32_0 = arith.constant 0 : i32
    %c0_i32_1 = arith.constant 0 : i32
    return %c0_i32, %c0_i32_0 : i32, i32
  }
  func.func @transform_4(%arg0: i32) -> (i32, i32, i32) {
    %c0_i32 = arith.constant 0 : i32
    %c0_i32_0 = arith.constant 0 : i32
    %c0_i32_1 = arith.constant 0 : i32
    %c0_i32_2 = arith.constant 0 : i32
    return %c0_i32, %c0_i32_0, %c0_i32_1 : i32, i32, i32
  }
  func.func @transform_5(%arg0: i32) -> (i32, i32) {
    %c0_i32 = arith.constant 0 : i32
    %c0_i32_0 = arith.constant 0 : i32
    %c0_i32_1 = arith.constant 0 : i32
    return %c0_i32, %c0_i32_0 : i32, i32
  }
  func.func @transform_6(%arg0: i32) -> (i32, i32) {
    %c0_i32 = arith.constant 0 : i32
    %c0_i32_0 = arith.constant 0 : i32
    %c0_i32_1 = arith.constant 0 : i32
    return %c0_i32, %c0_i32_0 : i32, i32
  }
  func.func @transform_7(%arg0: i32) -> (i32, i32) {
    %c0_i32 = arith.constant 0 : i32
    %c0_i32_0 = arith.constant 0 : i32
    %c0_i32_1 = arith.constant 0 : i32
    return %c0_i32, %c0_i32_0 : i32, i32
  }
  func.func @transform_8(%arg0: i32) -> (i32, i32) {
    %c0_i32 = arith.constant 0 : i32
    %c0_i32_0 = arith.constant 0 : i32
    %c0_i32_1 = arith.constant 0 : i32
    return %c0_i32, %c0_i32_0 : i32, i32
  }
  func.func @transform_9(%arg0: i32) -> (i32, i32) {
    %c0_i32 = arith.constant 0 : i32
    %c0_i32_0 = arith.constant 0 : i32
    %c0_i32_1 = arith.constant 0 : i32
    return %c0_i32, %c0_i32_0 : i32, i32
  }
  func.func @transform_10(%arg0: i32) -> (i32, i32) {
    %c0_i32 = arith.constant 0 : i32
    %c0_i32_0 = arith.constant 0 : i32
    %c0_i32_1 = arith.constant 0 : i32
    return %c0_i32, %c0_i32_0 : i32, i32
  }
  func.func @transform_11(%arg0: i32) -> (i32, i32) {
    %c0_i32 = arith.constant 0 : i32
    %c0_i32_0 = arith.constant 0 : i32
    %c0_i32_1 = arith.constant 0 : i32
    return %c0_i32, %c0_i32_0 : i32, i32
  }
}

</mosaic_0001>

<bundles_post_ra>
// kernel: basic_block_forward.1
= control target key start
LH: loop header
LB: loop body
LE: loop exit
PB: predicated region body
PF: predicated region fallthrough
CT: control target
= control target key end

     0   :  { %v1581_v0 = vmov 0.0   ;;  %vm1582_vm0 = vmmov 0   ;;  %vm79_vm1 = vcmask 523264   ;;  %vm439_vm2 = vcmask 516096   ;;  %s2033_s1 = inlined_call_operand.vmem [shape: f32[3,64,64], index: 1, kind: input, shape index: {}]   ;;  %s2034_s7 = inlined_call_operand.vmem [shape: f32[64,64], index: 7, kind: input, shape index: {}]   ;;  %s2035_s0 = inlined_call_operand.vmem [shape: f32[2,2,9,64], index: 0, kind: input, shape index: {}]   ;;  %s2036_s4 = inlined_call_operand.vmem [shape: f32[3,64,64], index: 4, kind: input, shape index: {}]   ;;  %s2037_s2 = inlined_call_operand.vmem [shape: f32[1,64], index: 2, kind: input, shape index: {}]   ;;  %s2038_s3 = inlined_call_operand.vmem [shape: f32[1,64], index: 3, kind: input, shape index: {}]   ;;  %s2039_s8 = inlined_call_operand.vmem [shape: f32[64,64], index: 8, kind: input, shape index: {}]   ;;  %s2040_s5 = inlined_call_operand.vmem [shape: f32[1,64], index: 5, kind: input, shape index: {}]   ;;  %s2041_s9 = inlined_call_operand.vmem [shape: f32[1,64], index: 9, kind: input, shape index: {}]   ;;  %s2042_s6 = inlined_call_operand.vmem [shape: f32[1,64], index: 6, kind: input, shape index: {}]   ;;  %s2043_s10 = inlined_call_operand.vmem [shape: f32[1,64], index: 10, kind: input, shape index: {}]   ;;  %s2044_s11 = inlined_call_operand.vmem [shape: f32[16,64], index: 11, kind: output, shape index: {}]  }
   0x1   :  { %1263 = vmatprep.subr.bf16.mxu0 %v1581_v0  ;;  %v1112_v1 = vld [vmem:[%s2033_s1 + $0x40] sm:$0xff]  ;;  %v1113_v2 = vld [vmem:[%s2033_s1 + $0x48] sm:$0xff]  ;;  %v1114_v3 = vld [vmem:[%s2033_s1 + $0x50] sm:$0xff]  ;;  %1271 = vmatprep.mubr.msk.bf16.mxu0 %vm1582_vm0, %v1581_v0  ;;  %440 = vst.msk [vmem:[#allocation2] sm:$0x1] %vm439_vm2, %v1581_v0 }
   0x2   :  { %v75_v4 = vpack.c.bf16 %v1113_v2, %v1112_v1  ;;  %v1115_v5 = vld [vmem:[%s2033_s1 + $0x58] sm:$0xff]  ;;  %v1116_v7 = vld [vmem:[%s2033_s1 + $0x60] sm:$0xff]  ;;  %v1117_v8 = vld [vmem:[%s2033_s1 + $0x68] sm:$0xff]  ;;  %441 = vst.msk [vmem:[#allocation2 + $0x10] sm:$0x1] %vm439_vm2, %v1581_v0 }
   0x3   :  { %v76_v6 = vpack.c.bf16 %v1115_v5, %v1114_v3  ;;  %v77_v9 = vpack.c.bf16 %v1117_v8, %v1116_v7  ;;  %v1118_v10 = vld [vmem:[%s2033_s1 + $0x70] sm:$0xff]  ;;  %v1119_v11 = vld [vmem:[%s2033_s1 + $0x78] sm:$0xff]  ;;  %v39_v12 = vld [vmem:[%s2034_s7] sm:$0xff]  ;;  %442 = vst.msk [vmem:[#allocation2 + $0x9] sm:$0x1] %vm439_vm2, %v1581_v0 }
   0x4   :  { %1264 = vmatpush3.bf16.msra.mxu0 %v75_v4  ;;  %v40_v13 = vld [vmem:[%s2034_s7 + $0x8] sm:$0xff]  ;;  %v41_v14 = vld [vmem:[%s2034_s7 + $0x10] sm:$0xff]  ;;  %v78_v15 = vpack.c.bf16 %v1119_v11, %v1118_v10  ;;  %v1110_v16 = vld [vmem:[%s2035_s0 + $0x20] sm:$0xff]  ;;  %443 = vst.msk [vmem:[#allocation2 + $0x19] sm:$0x1] %vm439_vm2, %v1581_v0 }
   0x5   :  { %1265 = vmatprep.subr.bf16.mxu0 %v1581_v0  ;;  %v1111_v17 = vld [vmem:[%s2035_s0 + $0x30] sm:$0xff]  ;;  %v1687_v18 = vpack.c.bf16 %v40_v13, %v39_v12  ;;  %v42_v19 = vld [vmem:[%s2034_s7 + $0x18] sm:$0xff]  ;;  %v50_v20 = vld [vmem:[%s2033_s1] sm:$0xff] }
   0x6   :  { %v51_v21 = vld [vmem:[%s2033_s1 + $0x8] sm:$0xff]  ;;  %v1699_v22 = vpack.c.bf16 %v42_v19, %v41_v14  ;;  %v43_v23 = vld [vmem:[%s2034_s7 + $0x20] sm:$0xff]  ;;  %v1708_v25 = vpack.c.bf16 %v1111_v17, %v1110_v16  ;;  %v52_v27 = vld [vmem:[%s2033_s1 + $0x10] sm:$0xff] }
   0x7   :  { %1462 = vmatprep.subr.bf16.mxu1 %v1687_v18  ;;  %v44_v24 = vld [vmem:[%s2034_s7 + $0x28] sm:$0xff]  ;;  %v58_v26 = vpack.c.bf16 %v51_v21, %v50_v20  ;;  %v53_v28 = vld [vmem:[%s2033_s1 + $0x18] sm:$0xff]  ;;  %v45_v30 = vld [vmem:[%s2034_s7 + $0x30] sm:$0xff] }
   0x8   :  { %1266 = vmatpush3.bf16.msra.mxu0 %v76_v6  ;;  %1464 = vmatpush3.bf16.msra.mxu1 %v1687_v18  ;;  %v1719_v29 = vpack.c.bf16 %v44_v24, %v43_v23  ;;  %v46_v31 = vld [vmem:[%s2034_s7 + $0x38] sm:$0xff]  ;;  %v59_v32 = vpack.c.bf16 %v53_v28, %v52_v27  ;;  %v54_v34 = vld [vmem:[%s2033_s1 + $0x20] sm:$0xff]  ;;  %v55_v35 = vld [vmem:[%s2033_s1 + $0x28] sm:$0xff] }
   0x9   :  { %1267 = vmatprep.subr.bf16.mxu0 %v1581_v0  ;;  %1466 = vmatprep.subr.bf16.mxu1 %v1699_v22  ;;  %v1732_v33 = vpack.c.bf16 %v46_v31, %v45_v30  ;;  %v60_v36 = vpack.c.bf16 %v55_v35, %v54_v34  ;;  %v56_v37 = vld [vmem:[%s2033_s1 + $0x30] sm:$0xff]  ;;  %v57_v38 = vld [vmem:[%s2033_s1 + $0x38] sm:$0xff]  ;;  %v47_v40 = vld [vmem:[%s2035_s0] sm:$0xff] }
   0xa   :  { %v61_v39 = vpack.c.bf16 %v57_v38, %v56_v37  ;;  %v48_v41 = vld [vmem:[%s2035_s0 + $0x10] sm:$0xff]  ;;  %v1122_v42 = vld [vmem:[%s2033_s1 + $0x80] sm:$0xff]  ;;  %v1123_v43 = vld [vmem:[%s2033_s1 + $0x88] sm:$0xff] }
   0xb   :  { %v49_v44 = vpack.c.bf16 %v48_v41, %v47_v40  ;;  %v180_v45 = vpack.c.bf16 %v1123_v43, %v1122_v42  ;;  %v1124_v46 = vld [vmem:[%s2033_s1 + $0x90] sm:$0xff]  ;;  %v1125_v47 = vld [vmem:[%s2033_s1 + $0x98] sm:$0xff]  ;;  %v1126_v49 = vld [vmem:[%s2033_s1 + $0xa0] sm:$0xff] }
   0xc   :  { %1268 = vmatpush3.bf16.msra.mxu0 %v77_v9  ;;  %1468 = vmatpush3.bf16.msra.mxu1 %v1699_v22  ;;  %v181_v48 = vpack.c.bf16 %v1125_v47, %v1124_v46  ;;  %v1127_v50 = vld [vmem:[%s2033_s1 + $0xa8] sm:$0xff]  ;;  %v1128_v52 = vld [vmem:[%s2033_s1 + $0xb0] sm:$0xff]  ;;  %v1129_v53 = vld [vmem:[%s2033_s1 + $0xb8] sm:$0xff] }
   0xd   :  { %1269 = vmatprep.subr.bf16.mxu0 %v1581_v0  ;;  %1470 = vmatprep.subr.bf16.mxu1 %v1719_v29  ;;  %v182_v51 = vpack.c.bf16 %v1127_v50, %v1126_v49  ;;  %v183_v54 = vpack.c.bf16 %v1129_v53, %v1128_v52  ;;  %v168_v55 = vld [vmem:[%s2035_s0 + $0x1] sm:$0xff]  ;;  %v169_v56 = vld [vmem:[%s2035_s0 + $0x11] sm:$0xff]  ;;  %v416_v47 = vld [vmem:[%s2037_s2] sm:$0x1] }
   0xe   :  { %v170_v57 = vpack.c.bf16 %v169_v56, %v168_v55  ;;  %v1137_v16 = vld [vmem:[%s2036_s4 + $0x48] sm:$0xff]  ;;  %v1138_v19 = vld [vmem:[%s2036_s4 + $0x50] sm:$0xff]  ;;  %v1139_v20 = vld [vmem:[%s2036_s4 + $0x58] sm:$0xff] }
   0xf   :  { %v474_v21 = vpack.c.bf16 %v1139_v20, %v1138_v19  ;;  %v1140_v23 = vld [vmem:[%s2036_s4 + $0x60] sm:$0xff]  ;;  %v1141_v24 = vld [vmem:[%s2036_s4 + $0x68] sm:$0xff]  ;;  %v1142_v27 = vld [vmem:[%s2036_s4 + $0x70] sm:$0xff] }
  0x10   :  { %1270 = vmatpush3.bf16.msra.mxu0 %v78_v15  ;;  %1472 = vmatpush3.bf16.msra.mxu1 %v1719_v29  ;;  %v1136_v15 = vld [vmem:[%s2036_s4 + $0x40] sm:$0xff]  ;;  %v1143_v28 = vld [vmem:[%s2036_s4 + $0x78] sm:$0xff] }
  0x11   :  { %1275 = vmatprep.subr.bf16.mxu0 %v1581_v0  ;;  %1474 = vmatprep.subr.bf16.mxu1 %v1732_v33  ;;  %v473_v17 = vpack.c.bf16 %v1137_v16, %v1136_v15  ;;  %v476_v30 = vpack.c.bf16 %v1143_v28, %v1142_v27  ;;  %v1135_v52 = vld [vmem:[%s2038_s3] ss:$0 sm:$0xff]  ;;  %v1149_v19 = vld [vmem:[%s2036_s4 + $0x98] sm:$0xff] }
  0x12   :  { %v1153_v27 = vld [vmem:[%s2036_s4 + $0xb8] sm:$0xff] }
  0x13   :  { %1272 = vmatmul.mubr.msk.bf16.vlgmr.msra.gmra.mrb[0].mxu0 %vm79_vm1, %v1708_v25 }
  0x14   :  { %1276 = vmatpush3.bf16.msra.mxu0 %v58_v26  ;;  %1283 = vmatprep.mubr.msk.bf16.mxu0 %vm1582_vm0, %v1581_v0  ;;  %v475_v26 = vpack.c.bf16 %v1141_v24, %v1140_v23  ;;  %v1151_v23 = vld [vmem:[%s2036_s4 + $0xa8] sm:$0xff] }
  0x15   :  { %1277 = vmatprep.subr.bf16.mxu0 %v1581_v0  ;;  %1476 = vmatpush3.bf16.msra.mxu1 %v1732_v33 }
  0x16   :  { %1478 = vmatprep.subr.bf16.mxu1 %v1687_v18 }
  0x18   :  { %1278 = vmatpush3.bf16.msra.mxu0 %v59_v32 }
  0x19   :  { %1279 = vmatprep.subr.bf16.mxu0 %v1581_v0 }
  0x1c   :  { %1280 = vmatpush3.bf16.msra.mxu0 %v60_v36 }
  0x1d   :  { %1281 = vmatprep.subr.bf16.mxu0 %v1581_v0 }
  0x20   :  { %1282 = vmatpush3.bf16.msra.mxu0 %v61_v39 }
  0x21   :  { %1287 = vmatprep.subr.bf16.mxu0 %v1581_v0 }
  0x23   :  { %1284 = vmatmul.mubr.msk.bf16.vlgmr.msra.gmra.mrb[0].mxu0 %vm79_vm1, %v49_v44 }
  0x24   :  { %1288 = vmatpush3.bf16.msra.mxu0 %v180_v45  ;;  %1295 = vmatprep.mubr.msk.bf16.mxu0 %vm1582_vm0, %v1581_v0  ;;  %v421_v45 = vlaneseq }
  0x25   :  { %1289 = vmatprep.subr.bf16.mxu0 %v1581_v0 }
  0x26   :  { %v422_v46 = vshrl.u32 %v421_v45, 7 }
  0x28   :  { %1290 = vmatpush3.bf16.msra.mxu0 %v181_v48  ;;  %v1860_v48 = vsub.s32 0, %v422_v46 }
  0x29   :  { %1291 = vmatprep.subr.bf16.mxu0 %v1581_v0 }
  0x2c   :  { %1292 = vmatpush3.bf16.msra.mxu0 %v182_v51 }
  0x2d   :  { %1293 = vmatprep.subr.bf16.mxu0 %v1581_v0 }
  0x30   :  { %1294 = vmatpush3.bf16.msra.mxu0 %v183_v54 }
  0x31   :  { %1494 = vmatprep.subr.bf16.mxu0 %v1687_v18 }
  0x33   :  { %1296 = vmatmul.mubr.msk.bf16.vlgmr.msra.gmra.mrb[0].mxu0 %vm79_vm1, %v170_v57 }
  0x34   :  { %1496 = vmatpush3.bf16.msra.mxu0 %v1687_v18 }
  0x35   :  { %1498 = vmatprep.subr.bf16.mxu0 %v1699_v22 }
  0x38   :  { %1500 = vmatpush3.bf16.msra.mxu0 %v1699_v22 }
  0x39   :  { %1502 = vmatprep.subr.bf16.mxu0 %v1719_v29 }
  0x3c   :  { %1504 = vmatpush3.bf16.msra.mxu0 %v1719_v29 }
  0x3d   :  { %1506 = vmatprep.subr.bf16.mxu0 %v1732_v33 }
  0x40   :  { %1508 = vmatpush3.bf16.msra.mxu0 %v1732_v33 }
  0x41   :  { %1510 = vmatprep.subr.bf16.mxu0 %v1687_v18 }
 0x106   :  { %v221_v58 = vpop.f32.mrb[0].mxu0 }
 0x107   :  { %v1297_v59 = vpop.f32.mrb[1].mxu0  ;;  %1315 = vmatprep.mubr.msk.f32.mxu1 %vm79_vm1, %v221_v58 }
 0x108   :  { %v224_v60 = vpop.f32.mrb[2].mxu0  ;;  %v449_v59 = vld [vmem:[%s2036_s4] sm:$0xff] }
 0x109   :  { %v1298_v61 = vpop.f32.mrb[3].mxu0  ;;  %1316 = vmatmul.mubr.msk.f32.vlgmr.msra.gmra.mrb[0].mxu1 %vm79_vm1, %v224_v60 }
 0x10a   :  { %1480 = vmatpush3.bf16.msra.mxu1 %v1687_v18 }
 0x10b   :  { %1482 = vmatprep.subr.bf16.mxu1 %v1699_v22 }
 0x10e   :  { %1484 = vmatpush3.bf16.msra.mxu1 %v1699_v22 }
 0x10f   :  { %1486 = vmatprep.subr.bf16.mxu1 %v1719_v29 }
 0x112   :  { %1488 = vmatpush3.bf16.msra.mxu1 %v1719_v29 }
 0x113   :  { %1490 = vmatprep.subr.bf16.mxu1 %v1732_v33 }
 0x116   :  { %1492 = vmatpush3.bf16.msra.mxu1 %v1732_v33 }
 0x117   :  { %1337 = vmatprep.subr.bf16.mxu1 %v1581_v0 }
 0x1dc   :  { %v1317_v62 = vpop.f32.mrb[0].mxu1 }
 0x1dd   :  { %v312_v63 = vsel %vm79_vm1, %v1317_v62, 0.0  ;;  %v302_v1 = vpop.f32.mrb[1].mxu1 }
 0x1de   :  { %v311_v2 = vsel %vm79_vm1, %v302_v1, 0.0 }
 0x1df   :  { %v313_v3 = vadd.f32 %v312_v63, %v311_v2  ;;  %v451_v2 = vld [vmem:[%s2036_s4 + $0x10] sm:$0xff] }
 0x1e1   :  { %v314_v4 = vrot.slane %v313_v3, 4 }
 0x1e3   :  { %v315_v5 = vadd.f32 %v314_v4, %v313_v3  ;;  %v452_v3 = vld [vmem:[%s2036_s4 + $0x18] sm:$0xff] }
 0x1e4   :  { %v458_v4 = vpack.c.bf16 %v452_v3, %v451_v2  ;;  %v844_v2 = vld [vmem:[%s2039_s8 + $0x38] sm:$0xff] }
 0x1e5   :  { %v316_v6 = vrot.slane %v315_v5, 2 }
 0x1e7   :  { %v317_v7 = vadd.f32 %v316_v6, %v315_v5  ;;  %v453_v5 = vld [vmem:[%s2036_s4 + $0x20] sm:$0xff]  ;;  %v454_v6 = vld [vmem:[%s2036_s4 + $0x28] sm:$0xff] }
 0x1e9   :  { %v318_v8 = vrot.slane %v317_v7, 1 }
 0x1eb   :  { %v319_v9 = vadd.f32 %v318_v8, %v317_v7  ;;  %v459_v7 = vpack.c.bf16 %v454_v6, %v453_v5  ;;  %v455_v8 = vld [vmem:[%s2036_s4 + $0x30] sm:$0xff] }
 0x1ed   :  { %v320_v10 = vmul.f32 0.0625, %v319_v9  ;;  %v456_v9 = vld [vmem:[%s2036_s4 + $0x38] sm:$0xff] }
 0x1ef   :  { %v322_v11 = vsub.f32 %v224_v60, %v320_v10  ;;  %v321_v12 = vsub.f32 %v221_v58, %v320_v10  ;;  %v450_v60 = vld [vmem:[%s2036_s4 + $0x8] sm:$0xff]  ;;  %v460_v10 = vpack.c.bf16 %v456_v9, %v455_v8 }
 0x1f0   :  { %v457_v63 = vpack.c.bf16 %v450_v60, %v449_v59  ;;  %v840_v59 = vld [vmem:[%s2039_s8 + $0x18] sm:$0xff] }
 0x1f1   :  { %v323_v13 = vmul.f32 %v321_v12, %v321_v12  ;;  %v324_v14 = vmul.f32 %v322_v11, %v322_v11 }
 0x1f3   :  { %1334 = vmatprep.mubr.msk.f32.mxu1 %vm79_vm1, %v323_v13 }
 0x1f4   :  { %1335 = vmatmul.mubr.msk.f32.vlgmr.msra.gmra.mrb[2].mxu1 %vm79_vm1, %v324_v14 }
 0x1f5   :  { %1345 = vmatprep.mubr.msk.bf16.mxu1 %vm1582_vm0, %v1581_v0  ;;  %1338 = vmatpush3.bf16.msra.mxu1 %v473_v17  ;;  %v1148_v17 = vld [vmem:[%s2036_s4 + $0x90] sm:$0xff] }
 0x1f6   :  { %1339 = vmatprep.subr.bf16.mxu1 %v1581_v0  ;;  %v578_v20 = vpack.c.bf16 %v1149_v19, %v1148_v17 }
 0x1f9   :  { %1340 = vmatpush3.bf16.msra.mxu1 %v474_v21  ;;  %v1150_v21 = vld [vmem:[%s2036_s4 + $0xa0] sm:$0xff] }
 0x1fa   :  { %1341 = vmatprep.subr.bf16.mxu1 %v1581_v0  ;;  %v579_v24 = vpack.c.bf16 %v1151_v23, %v1150_v21 }
 0x1fd   :  { %1342 = vmatpush3.bf16.msra.mxu1 %v475_v26  ;;  %v1152_v26 = vld [vmem:[%s2036_s4 + $0xb0] sm:$0xff] }
 0x1fe   :  { %1343 = vmatprep.subr.bf16.mxu1 %v1581_v0  ;;  %v580_v28 = vpack.c.bf16 %v1153_v27, %v1152_v26 }
 0x201   :  { %1344 = vmatpush3.bf16.msra.mxu1 %v476_v30 }
 0x202   :  { %1349 = vmatprep.subr.bf16.mxu1 %v1581_v0 }
 0x2c7   :  { %v1336_v31 = vpop.f32.mrb[2].mxu1 }
 0x2c8   :  { %v407_v32 = vsel %vm79_vm1, %v1336_v31, 0.0  ;;  %v397_v34 = vpop.f32.mrb[3].mxu1 }
 0x2c9   :  { %v406_v35 = vsel %vm79_vm1, %v397_v34, 0.0 }
 0x2ca   :  { %v408_v36 = vadd.f32 %v407_v32, %v406_v35 }
 0x2cc   :  { %v409_v37 = vrot.slane %v408_v36, 4 }
 0x2ce   :  { %v410_v38 = vadd.f32 %v409_v37, %v408_v36 }
 0x2d0   :  { %v411_v39 = vrot.slane %v410_v38, 2 }
 0x2d2   :  { %v412_v40 = vadd.f32 %v411_v39, %v410_v38 }
 0x2d4   :  { %v413_v41 = vrot.slane %v412_v40, 1 }
 0x2d6   :  { %v414_v42 = vadd.f32 %v413_v41, %v412_v40 }
 0x2d8   :  { %v415_v43 = vmul.f32 0.0625, %v414_v42 }
 0x2da   :  { %v417_v44 = vadd.f32 1e-05, %v415_v43 }
 0x2dc   :  { %1575 = vrsqrt.f32 %v417_v44 }
 0x2e6   :  { %v1576_v49 = vpop.eup %1575 }
 0x2e7   :  { %v419_v50 = vmul.f32 %v1576_v49, %v416_v47 }
 0x2e9   :  { %v424_v51 = vrot.slane %v419_v50, %v1860_v48 }
 0x2eb   :  { %v426_v53 = vmul.f32 %v424_v51, %v321_v12  ;;  %v427_v54 = vmul.f32 %v424_v51, %v322_v11  ;;  %v1146_v11 = vld [vmem:[%s2036_s4 + $0x80] sm:$0xff]  ;;  %v1147_v12 = vld [vmem:[%s2036_s4 + $0x88] sm:$0xff] }
 0x2ec   :  { %v577_v15 = vpack.c.bf16 %v1147_v12, %v1146_v11  ;;  %v837_v51 = vld [vmem:[%s2039_s8] sm:$0xff] }
 0x2ed   :  { %v435_v55 = vadd.f32 %v1135_v52, %v426_v53  ;;  %v436_v56 = vadd.f32 %v1135_v52, %v427_v54  ;;  %v838_v52 = vld [vmem:[%s2039_s8 + $0x8] sm:$0xff] }
 0x2ef   :  { %v437_v57 = vmax.f32 %v435_v55, 0.0  ;;  %v438_v58 = vmax.f32 %v436_v56, 0.0 }
 0x2f1   :  { %444 = vst.msk [vmem:[#allocation2 + $0x1] sm:$0xff] %vm79_vm1, %v437_v57  ;;  %445 = vst.msk [vmem:[#allocation2 + $0x11] sm:$0xff] %vm79_vm1, %v438_v58  ;;  %v845_v57 = vpack.c.bf16 %v838_v52, %v837_v51  ;;  %v839_v58 = vld [vmem:[%s2039_s8 + $0x10] sm:$0xff]  ;;  %v813_v51 = vld [vmem:[%s2040_s5] sm:$0x1] }
 0x2f2   :  { %v846_v60 = vpack.c.bf16 %v840_v59, %v839_v58 }
 0x2f8   :  { %v461_v61 = vld [vmem:[#allocation2 + $0x1] sm:$0xff]  ;;  %v462_v62 = vld [vmem:[#allocation2 + $0x11] sm:$0xff] }
 0x2f9   :  { %v463_v1 = vpack.c.bf16 %v462_v62, %v461_v61  ;;  %v446_v13 = vld [vmem:[#allocation2] sm:$0xff]  ;;  %v447_v14 = vld [vmem:[#allocation2 + $0x10] sm:$0xff]  ;;  %v842_v62 = vld [vmem:[%s2039_s8 + $0x28] sm:$0xff] }
 0x2fa   :  { %v448_v16 = vpack.c.bf16 %v447_v14, %v446_v13  ;;  %v565_v30 = vld [vmem:[#allocation2 + $0x2] sm:$0xff]  ;;  %v566_v31 = vld [vmem:[#allocation2 + $0x12] sm:$0xff] }
 0x2fb   :  { %1346 = vmatmul.mubr.msk.bf16.vlgmr.msra.gmra.mrb[4].mxu1 %vm79_vm1, %v463_v1  ;;  %v567_v32 = vpack.c.bf16 %v566_v31, %v565_v30  ;;  %v841_v61 = vld [vmem:[%s2039_s8 + $0x20] sm:$0xff]  ;;  %v843_v1 = vld [vmem:[%s2039_s8 + $0x30] sm:$0xff] }
 0x2fc   :  { %1350 = vmatpush3.bf16.msra.mxu1 %v457_v63  ;;  %1357 = vmatprep.mubr.msk.bf16.mxu1 %vm1582_vm0, %v1581_v0  ;;  %v847_v63 = vpack.c.bf16 %v842_v62, %v841_v61  ;;  %v848_v3 = vpack.c.bf16 %v844_v2, %v843_v1  ;;  %v1159_v62 = vld [vmem:[%s2042_s6] ss:$0 sm:$0xff] }
 0x2fd   :  { %1351 = vmatprep.subr.bf16.mxu1 %v1581_v0 }
 0x300   :  { %1352 = vmatpush3.bf16.msra.mxu1 %v458_v4 }
 0x301   :  { %1353 = vmatprep.subr.bf16.mxu1 %v1581_v0 }
 0x304   :  { %1354 = vmatpush3.bf16.msra.mxu1 %v459_v7 }
 0x305   :  { %1355 = vmatprep.subr.bf16.mxu1 %v1581_v0 }
 0x308   :  { %1356 = vmatpush3.bf16.msra.mxu1 %v460_v10 }
 0x309   :  { %1361 = vmatprep.subr.bf16.mxu1 %v1581_v0 }
 0x30b   :  { %1358 = vmatmul.mubr.msk.bf16.vlgmr.msra.gmra.mrb[4].mxu1 %vm79_vm1, %v448_v16 }
 0x30c   :  { %1362 = vmatpush3.bf16.msra.mxu1 %v577_v15  ;;  %1369 = vmatprep.mubr.msk.bf16.mxu1 %vm1582_vm0, %v1581_v0 }
 0x30d   :  { %1363 = vmatprep.subr.bf16.mxu1 %v1581_v0 }
 0x310   :  { %1364 = vmatpush3.bf16.msra.mxu1 %v578_v20 }
 0x311   :  { %1365 = vmatprep.subr.bf16.mxu1 %v1581_v0 }
 0x314   :  { %1366 = vmatpush3.bf16.msra.mxu1 %v579_v24 }
 0x315   :  { %1367 = vmatprep.subr.bf16.mxu1 %v1581_v0 }
 0x318   :  { %1368 = vmatpush3.bf16.msra.mxu1 %v580_v28 }
 0x319   :  { %1526 = vmatprep.subr.bf16.mxu1 %v1687_v18 }
 0x31b   :  { %1370 = vmatmul.mubr.msk.bf16.vlgmr.msra.gmra.mrb[4].mxu1 %vm79_vm1, %v567_v32 }
 0x31c   :  { %1528 = vmatpush3.bf16.msra.mxu1 %v1687_v18 }
 0x31d   :  { %1530 = vmatprep.subr.bf16.mxu1 %v1699_v22 }
 0x320   :  { %1532 = vmatpush3.bf16.msra.mxu1 %v1699_v22 }
 0x321   :  { %1534 = vmatprep.subr.bf16.mxu1 %v1719_v29 }
 0x324   :  { %1536 = vmatpush3.bf16.msra.mxu1 %v1719_v29 }
 0x325   :  { %1538 = vmatprep.subr.bf16.mxu1 %v1732_v33 }
 0x328   :  { %1540 = vmatpush3.bf16.msra.mxu1 %v1732_v33 }
 0x3ee   :  { %v618_v34 = vpop.f32.mrb[4].mxu1 }
 0x3ef   :  { %v1371_v35 = vpop.f32.mrb[5].mxu1  ;;  %1389 = vmatprep.mubr.msk.f32.mxu0 %vm79_vm1, %v618_v34 }
 0x3f0   :  { %v621_v36 = vpop.f32.mrb[6].mxu1 }
 0x3f1   :  { %v1372_v37 = vpop.f32.mrb[7].mxu1  ;;  %1390 = vmatmul.mubr.msk.f32.vlgmr.msra.gmra.mrb[4].mxu0 %vm79_vm1, %v621_v36 }
 0x3f2   :  { %1512 = vmatpush3.bf16.msra.mxu0 %v1687_v18 }
 0x3f3   :  { %1514 = vmatprep.subr.bf16.mxu0 %v1699_v22 }
 0x3f6   :  { %1516 = vmatpush3.bf16.msra.mxu0 %v1699_v22 }
 0x3f7   :  { %1518 = vmatprep.subr.bf16.mxu0 %v1719_v29 }
 0x3fa   :  { %1520 = vmatpush3.bf16.msra.mxu0 %v1719_v29 }
 0x3fb   :  { %1522 = vmatprep.subr.bf16.mxu0 %v1732_v33 }
 0x3fe   :  { %1524 = vmatpush3.bf16.msra.mxu0 %v1732_v33 }
 0x3ff   :  { %1411 = vmatprep.subr.bf16.mxu0 %v1581_v0 }
 0x4c4   :  { %v1391_v38 = vpop.f32.mrb[4].mxu0 }
 0x4c5   :  { %v709_v39 = vsel %vm79_vm1, %v1391_v38, 0.0  ;;  %v699_v40 = vpop.f32.mrb[5].mxu0 }
 0x4c6   :  { %v708_v41 = vsel %vm79_vm1, %v699_v40, 0.0 }
 0x4c7   :  { %v710_v42 = vadd.f32 %v709_v39, %v708_v41 }
 0x4c9   :  { %v711_v43 = vrot.slane %v710_v42, 4 }
 0x4cb   :  { %v712_v44 = vadd.f32 %v711_v43, %v710_v42 }
 0x4cd   :  { %v713_v45 = vrot.slane %v712_v44, 2 }
 0x4cf   :  { %v714_v46 = vadd.f32 %v713_v45, %v712_v44 }
 0x4d1   :  { %v715_v47 = vrot.slane %v714_v46, 1 }
 0x4d3   :  { %v716_v49 = vadd.f32 %v715_v47, %v714_v46 }
 0x4d5   :  { %v717_v50 = vmul.f32 0.0625, %v716_v49 }
 0x4d7   :  { %v1956_v53 = vsub.f32 %v621_v36, %v717_v50  ;;  %v1958_v54 = vsub.f32 %v618_v34, %v717_v50 }
 0x4d9   :  { %v720_v55 = vmul.f32 %v1958_v54, %v1958_v54  ;;  %v721_v56 = vmul.f32 %v1956_v53, %v1956_v53 }
 0x4db   :  { %1408 = vmatprep.mubr.msk.f32.mxu0 %vm79_vm1, %v720_v55  ;;  %v1079_v55 = vld [vmem:[%s2041_s9] sm:$0x1] }
 0x4dc   :  { %1409 = vmatmul.mubr.msk.f32.vlgmr.msra.gmra.mrb[6].mxu0 %vm79_vm1, %v721_v56 }
 0x4dd   :  { %1412 = vmatpush3.bf16.msra.mxu0 %v845_v57  ;;  %1419 = vmatprep.mubr.msk.bf16.mxu0 %vm1582_vm0, %v1581_v0 }
 0x4de   :  { %1413 = vmatprep.subr.bf16.mxu0 %v1581_v0 }
 0x4e1   :  { %1414 = vmatpush3.bf16.msra.mxu0 %v846_v60 }
 0x4e2   :  { %1415 = vmatprep.subr.bf16.mxu0 %v1581_v0 }
 0x4e5   :  { %1416 = vmatpush3.bf16.msra.mxu0 %v847_v63  ;;  %v1167_v63 = vld [vmem:[%s2043_s10] ss:$0 sm:$0xff] }
 0x4e6   :  { %1417 = vmatprep.subr.bf16.mxu0 %v1581_v0 }
 0x4e9   :  { %1418 = vmatpush3.bf16.msra.mxu0 %v848_v3 }
 0x4ea   :  { %1542 = vmatprep.subr.bf16.mxu0 %v1687_v18 }
 0x4ec   :  { %1420 = vmatmul.mubr.msk.bf16.vlgmr.msra.gmra.mrb[8].mxu0 %vm79_vm1, %v1708_v25 }
 0x4ed   :  { %1544 = vmatpush3.bf16.msra.mxu0 %v1687_v18 }
 0x4ee   :  { %1546 = vmatprep.subr.bf16.mxu0 %v1699_v22 }
 0x4f1   :  { %1548 = vmatpush3.bf16.msra.mxu0 %v1699_v22 }
 0x4f2   :  { %1550 = vmatprep.subr.bf16.mxu0 %v1719_v29 }
 0x4f5   :  { %1552 = vmatpush3.bf16.msra.mxu0 %v1719_v29 }
 0x4f6   :  { %1554 = vmatprep.subr.bf16.mxu0 %v1732_v33 }
 0x4f9   :  { %1556 = vmatpush3.bf16.msra.mxu0 %v1732_v33 }
 0x5af   :  { %v1410_v0 = vpop.f32.mrb[6].mxu0 }
 0x5b0   :  { %v804_v4 = vsel %vm79_vm1, %v1410_v0, 0.0  ;;  %v794_v5 = vpop.f32.mrb[7].mxu0 }
 0x5b1   :  { %v803_v25 = vsel %vm79_vm1, %v794_v5, 0.0 }
 0x5b2   :  { %v805_v6 = vadd.f32 %v804_v4, %v803_v25 }
 0x5b4   :  { %v806_v26 = vrot.slane %v805_v6, 4 }
 0x5b6   :  { %v807_v27 = vadd.f32 %v806_v26, %v805_v6 }
 0x5b8   :  { %v808_v28 = vrot.slane %v807_v27, 2 }
 0x5ba   :  { %v809_v30 = vadd.f32 %v808_v28, %v807_v27 }
 0x5bc   :  { %v810_v31 = vrot.slane %v809_v30, 1 }
 0x5be   :  { %v811_v34 = vadd.f32 %v810_v31, %v809_v30 }
 0x5bf   :  { %v886_v18 = vpop.f32.mrb[8].mxu0 }
 0x5c0   :  { %v1421_v7 = vpop.f32.mrb[9].mxu0  ;;  %1439 = vmatprep.mubr.msk.f32.mxu1 %vm79_vm1, %v886_v18  ;;  %v812_v39 = vmul.f32 0.0625, %v811_v34 }
 0x5c1   :  { %v889_v22 = vpop.f32.mrb[10].mxu0 }
 0x5c2   :  { %v1422_v8 = vpop.f32.mrb[11].mxu0  ;;  %1440 = vmatmul.mubr.msk.f32.vlgmr.msra.gmra.mrb[8].mxu1 %vm79_vm1, %v889_v22  ;;  %v814_v42 = vadd.f32 1e-05, %v812_v39 }
 0x5c4   :  { %1577 = vrsqrt.f32 %v814_v42 }
 0x5ce   :  { %v1578_v50 = vpop.eup %1577 }
 0x5cf   :  { %v816_v52 = vmul.f32 %v1578_v50, %v813_v51 }
 0x5d1   :  { %v821_v56 = vrot.slane %v816_v52, %v1860_v48 }
 0x5d3   :  { %v823_v59 = vmul.f32 %v821_v56, %v1958_v54  ;;  %v824_v60 = vmul.f32 %v821_v56, %v1956_v53 }
 0x5d5   :  { %v832_v3 = vadd.f32 %v1159_v62, %v823_v59  ;;  %v833_v0 = vadd.f32 %v1159_v62, %v824_v60 }
 0x695   :  { %v1441_v29 = vpop.f32.mrb[8].mxu1 }
 0x696   :  { %v975_v9 = vsel %vm79_vm1, %v1441_v29, 0.0  ;;  %v965_v10 = vpop.f32.mrb[9].mxu1 }
 0x697   :  { %v974_v33 = vsel %vm79_vm1, %v965_v10, 0.0 }
 0x698   :  { %v976_v11 = vadd.f32 %v975_v9, %v974_v33 }
 0x69a   :  { %v977_v12 = vrot.slane %v976_v11, 4 }
 0x69c   :  { %v978_v13 = vadd.f32 %v977_v12, %v976_v11 }
 0x69e   :  { %v979_v14 = vrot.slane %v978_v13, 2 }
 0x6a0   :  { %v980_v15 = vadd.f32 %v979_v14, %v978_v13 }
 0x6a2   :  { %v981_v16 = vrot.slane %v980_v15, 1 }
 0x6a4   :  { %v982_v17 = vadd.f32 %v981_v16, %v980_v15 }
 0x6a6   :  { %v983_v19 = vmul.f32 0.0625, %v982_v17 }
 0x6a8   :  { %v985_v20 = vsub.f32 %v889_v22, %v983_v19  ;;  %v984_v21 = vsub.f32 %v886_v18, %v983_v19 }
 0x6aa   :  { %v986_v23 = vmul.f32 %v984_v21, %v984_v21  ;;  %v987_v24 = vmul.f32 %v985_v20, %v985_v20 }
 0x6ac   :  { %1458 = vmatprep.mubr.msk.f32.mxu0 %vm79_vm1, %v986_v23 }
 0x6ad   :  { %1459 = vmatmul.mubr.msk.f32.vlgmr.msra.gmra.mrb[12].mxu0 %vm79_vm1, %v987_v24 }
 0x780   :  { %v1460_v32 = vpop.f32.mrb[12].mxu0 }
 0x781   :  { %v1070_v35 = vsel %vm79_vm1, %v1460_v32, 0.0  ;;  %v1060_v36 = vpop.f32.mrb[13].mxu0 }
 0x782   :  { %v1069_v37 = vsel %vm79_vm1, %v1060_v36, 0.0 }
 0x783   :  { %v1071_v38 = vadd.f32 %v1070_v35, %v1069_v37 }
 0x785   :  { %v1072_v40 = vrot.slane %v1071_v38, 4 }
 0x787   :  { %v1073_v41 = vadd.f32 %v1072_v40, %v1071_v38 }
 0x789   :  { %v1074_v43 = vrot.slane %v1073_v41, 2 }
 0x78b   :  { %v1075_v44 = vadd.f32 %v1074_v43, %v1073_v41 }
 0x78d   :  { %v1076_v45 = vrot.slane %v1075_v44, 1 }
 0x78f   :  { %v1077_v46 = vadd.f32 %v1076_v45, %v1075_v44 }
 0x791   :  { %v1078_v47 = vmul.f32 0.0625, %v1077_v46 }
 0x793   :  { %v1080_v49 = vadd.f32 1e-05, %v1078_v47 }
 0x795   :  { %1579 = vrsqrt.f32 %v1080_v49 }
 0x79f   :  { %v1580_v57 = vpop.eup %1579 }
 0x7a0   :  { %v1082_v58 = vmul.f32 %v1580_v57, %v1079_v55 }
 0x7a2   :  { %v1087_v61 = vrot.slane %v1082_v58, %v1860_v48 }
 0x7a4   :  { %v1089_v1 = vmul.f32 %v1087_v61, %v984_v21  ;;  %v1090_v2 = vmul.f32 %v1087_v61, %v985_v20 }
 0x7a6   :  { %v1098_v4 = vadd.f32 %v1167_v63, %v1089_v1  ;;  %v1099_v5 = vadd.f32 %v1167_v63, %v1090_v2 }
 0x7a8   :  { %v1100_v25 = vadd.f32 %v1098_v4, %v832_v3  ;;  %v1101_v54 = vadd.f32 %v1099_v5, %v833_v0 }
 0x7aa   :  { %v1102_v6 = vmax.f32 %v1100_v25, 0.0  ;;  %v1103_v53 = vmax.f32 %v1101_v54, 0.0 }
 0x7ac   :  { %1104 = vst.msk [vmem:[%s2044_s11] sm:$0xff] %vm79_vm1, %v1102_v6  ;;  %1105 = vst.msk [vmem:[%s2044_s11 + $0x8] sm:$0xff] %vm79_vm1, %v1103_v53 }

</bundles_post_ra>
